<compile_context>
chip_gen: v7x
topology: tpu7x:2x2x1
jax: 0.10.0
libtpu: 0.0.40
codegen_flags: <defaults>
</compile_context>

<pallas_src>
import jax
import jax.numpy as jnp
import numpy as np
from jax import lax
from jax.experimental import pallas as pl
from jax.experimental.pallas import tpu as pltpu


def _decoder_kernel(x_ref, h0_ref, wih_ref, whh_ref, bi_ref, bhn_ref,
                    wout_ref, bout_ref,
                    logp_ref, hfin_ref):
    TB, _ = x_ref.shape
    Bp, H = h0_ref.shape
    T = TB // Bp

    # ---- Hoisted, fused input projection: one MXU matmul for all T & gates.
    # (T*Bp, I) @ (I, 3H) + (1, 3H)  ->  (T*Bp, 3H), gate order [r | z | n].
    gi_all = jnp.dot(x_ref[...], wih_ref[...],
                     preferred_element_type=jnp.float32) + bi_ref[...]
    # Split into per-gate slabs once, off the critical path.
    gi_r = gi_all[:, :H]
    gi_z = gi_all[:, H:2 * H]
    gi_n = gi_all[:, 2 * H:3 * H]

    w_hh = whh_ref[...]                               # (H, 3H) fused [r | z | n]
    b_hn = bhn_ref[...]                               # (1, H)

    # ---- Recurrence: fully unrolled, h carried in registers. --------------
    h = h0_ref[...]                                   # (Bp, H)
    h_first = None
    for t in range(T):                                # static, tile-aligned slices
        lo, hi = t * Bp, (t + 1) * Bp
        gh = jnp.dot(h, w_hh, preferred_element_type=jnp.float32)   # (Bp, 3H)
        r = jax.nn.sigmoid(gi_r[lo:hi] + gh[:, :H])
        z = jax.nn.sigmoid(gi_z[lo:hi] + gh[:, H:2 * H])
        n = jnp.tanh(gi_n[lo:hi] + r * (gh[:, 2 * H:3 * H] + b_hn))
        h = n + z * (h - n)                           # == (1-z)*n + z*h
        if t == 0:
            h_first = h

    hfin_ref[...] = h

    # ---- Output head on output[0] (hidden after the first step). ----------
    logits = jnp.dot(h_first, wout_ref[...],
                     preferred_element_type=jnp.float32) + bout_ref[...]  # (Bp, O_pad)
    m = jnp.max(logits, axis=1, keepdims=True)
    shifted = logits - m
    lse = jnp.log(jnp.sum(jnp.exp(shifted), axis=1, keepdims=True))
    logp_ref[...] = shifted - lse


def prepare_decoder_params(params):
    """One-time weight re-layout (call at init, reuse across forward calls)."""
    H = params["w_hh"].shape[1]
    O = params["w_out"].shape[0]
    O_pad = max(128, -(-O // 128) * 128)              # lane-dense output width

    # Fused (columns ordered r|z|n) transposed weights for x @ W^T / h @ W^T.
    w_ih_f = jnp.asarray(params["w_ih"], jnp.float32).T        # (I, 3H)
    w_hh_f = jnp.asarray(params["w_hh"], jnp.float32).T        # (H, 3H)

    b_ih = jnp.asarray(params["b_ih"], jnp.float32)
    b_hh = jnp.asarray(params["b_hh"], jnp.float32)
    # r, z input-side biases absorb the hidden-side biases; n keeps b_hn
    # separate (it sits inside the r * (...) term).
    b_in = jnp.concatenate([b_ih[:2 * H] + b_hh[:2 * H],
                            b_ih[2 * H:]]).reshape(1, 3 * H)   # (1, 3H)
    b_hn = b_hh[2 * H:].reshape(1, H)                          # (1, H)

    # Lane-dense padded output head: zero weights / -1e30 bias in pad columns.
    w_out_p = jnp.zeros((H, O_pad), jnp.float32).at[:, :O].set(
        jnp.asarray(params["w_out"], jnp.float32).T)
    b_out_p = jnp.full((1, O_pad), -1e30, jnp.float32).at[:, :O].set(
        jnp.asarray(params["b_out"], jnp.float32))

    return {
        "w_ih_f": w_ih_f, "w_hh_f": w_hh_f,
        "b_in": b_in, "b_hn": b_hn,
        "w_out_p": w_out_p, "b_out_p": b_out_p,
        "hidden_size": int(H), "output_size": int(O), "output_pad": int(O_pad),
    }


def text_decoder_forward(input_seq, hidden, prepped):
    """Pallas implementation of TextDecoder.forward.

    input_seq: (T, B, I) float32
    hidden:    (1, B, H) float32
    prepped:   output of prepare_decoder_params(params)
    returns (logprobs (B, O), hidden_out (1, B, H))
    """
    T, B, I = input_seq.shape
    H = prepped["hidden_size"]
    O = prepped["output_size"]
    O_pad = prepped["output_pad"]

    # Pad batch to a full (8, lane) sublane tile so per-step gi slices are
    # tile-aligned inside the kernel.  Pad rows are zeros and sliced off.
    B_pad = max(8, -(-B // 8) * 8)
    if B_pad != B:
        x = jnp.pad(input_seq, ((0, 0), (0, B_pad - B), (0, 0)))
        h0 = jnp.pad(hidden[0], ((0, B_pad - B), (0, 0)))
    else:
        x = input_seq
        h0 = hidden[0]
    x2d = x.reshape(T * B_pad, I)

    grid_spec = pltpu.PrefetchScalarGridSpec(
        num_scalar_prefetch=0,
        grid=(1,),
        in_specs=[
            pl.BlockSpec((T * B_pad, I), lambda i: (0, 0)),    # x (all timesteps)
            pl.BlockSpec((B_pad, H), lambda i: (0, 0)),        # h0
            pl.BlockSpec((I, 3 * H), lambda i: (0, 0)),        # W_ih^T fused [r|z|n]
            pl.BlockSpec((H, 3 * H), lambda i: (0, 0)),        # W_hh^T fused [r|z|n]
            pl.BlockSpec((1, 3 * H), lambda i: (0, 0)),        # fused input biases
            pl.BlockSpec((1, H), lambda i: (0, 0)),            # b_hn
            pl.BlockSpec((H, O_pad), lambda i: (0, 0)),        # W_out^T (padded)
            pl.BlockSpec((1, O_pad), lambda i: (0, 0)),        # b_out (padded)
        ],
        out_specs=[
            pl.BlockSpec((B_pad, O_pad), lambda i: (0, 0)),    # log-probs (padded)
            pl.BlockSpec((B_pad, H), lambda i: (0, 0)),        # final hidden
        ],
    )

    logp_pad, h_fin = pl.pallas_call(
        _decoder_kernel,
        out_shape=(
            jax.ShapeDtypeStruct((B_pad, O_pad), jnp.float32),
            jax.ShapeDtypeStruct((B_pad, H), jnp.float32),
        ),
        grid_spec=grid_spec,
        compiler_params=pltpu.CompilerParams(
            dimension_semantics=("arbitrary",)),   # single sequential step
    )(x2d, h0, prepped["w_ih_f"], prepped["w_hh_f"], prepped["b_in"],
      prepped["b_hn"], prepped["w_out_p"], prepped["b_out_p"])

    return logp_pad[:B, :O], h_fin[:B][None]


def text_decoder_reference(input_seq, hidden, params):
    """Pure-JAX reference matching PyTorch nn.GRU + Linear + LogSoftmax."""
    H = hidden.shape[-1]
    w_ih, w_hh = params["w_ih"], params["w_hh"]
    b_ih, b_hh = params["b_ih"], params["b_hh"]

    def step(h, x_t):
        gi = x_t @ w_ih.T + b_ih
        gh = h @ w_hh.T + b_hh
        i_r, i_z, i_n = gi[:, :H], gi[:, H:2 * H], gi[:, 2 * H:]
        h_r, h_z, h_n = gh[:, :H], gh[:, H:2 * H], gh[:, 2 * H:]
        r = jax.nn.sigmoid(i_r + h_r)
        z = jax.nn.sigmoid(i_z + h_z)
        n = jnp.tanh(i_n + r * h_n)
        h_new = (1.0 - z) * n + z * h
        return h_new, h_new

    h_last, outs = lax.scan(step, hidden[0], input_seq)
    logits = outs[0] @ params["w_out"].T + params["b_out"]
    logp = jax.nn.log_softmax(logits, axis=1)
    return logp, h_last[None]


if __name__ == "__main__":
    # Shapes consistent with TextDecoder(input_size, hidden_size, output_size)
    T, B = 8, 2
    input_size, hidden_size, output_size = 48, 32, 16

    key = jax.random.PRNGKey(0)
    keys = jax.random.split(key, 8)
    bound = 1.0 / np.sqrt(hidden_size)

    params = {
        "w_ih": jax.random.uniform(keys[0], (3 * hidden_size, input_size),
                                   jnp.float32, -bound, bound),
        "w_hh": jax.random.uniform(keys[1], (3 * hidden_size, hidden_size),
                                   jnp.float32, -bound, bound),
        "b_ih": jax.random.uniform(keys[2], (3 * hidden_size,),
                                   jnp.float32, -bound, bound),
        "b_hh": jax.random.uniform(keys[3], (3 * hidden_size,),
                                   jnp.float32, -bound, bound),
        "w_out": jax.random.uniform(keys[4], (output_size, hidden_size),
                                    jnp.float32, -bound, bound),
        "b_out": jax.random.uniform(keys[5], (output_size,),
                                    jnp.float32, -bound, bound),
    }

    input_seq = jax.random.normal(keys[6], (T, B, input_size), jnp.float32)
    hidden0 = jax.random.normal(keys[7], (1, B, hidden_size), jnp.float32)

    # One-time weight re-layout (cached across forward calls).
    prepped = prepare_decoder_params(params)

    logp, h_fin = text_decoder_forward(input_seq, hidden0, prepped)
    logp, h_fin = jax.block_until_ready((logp, h_fin))

    ref_logp, ref_h = text_decoder_reference(input_seq, hidden0, params)
    np.testing.assert_allclose(np.asarray(logp), np.asarray(ref_logp),
                               rtol=1e-3, atol=1e-3)
    np.testing.assert_allclose(np.asarray(h_fin), np.asarray(ref_h),
                               rtol=1e-3, atol=1e-3)

    print("KERNEL_OK")
</pallas_src>

<mosaic_0001>
module attributes {stable_mosaic.version = 11 : i64} {
  func.func @_decoder_kernel(%arg0: i32, %arg1: memref<64x48xf32, #tpu.memory_space<vmem>>, %arg2: memref<8x32xf32, #tpu.memory_space<vmem>>, %arg3: memref<48x96xf32, #tpu.memory_space<vmem>>, %arg4: memref<32x96xf32, #tpu.memory_space<vmem>>, %arg5: memref<1x96xf32, #tpu.memory_space<vmem>>, %arg6: memref<1x32xf32, #tpu.memory_space<vmem>>, %arg7: memref<32x128xf32, #tpu.memory_space<vmem>>, %arg8: memref<1x128xf32, #tpu.memory_space<vmem>>, %arg9: memref<8x128xf32, #tpu.memory_space<vmem>>, %arg10: memref<8x32xf32, #tpu.memory_space<vmem>>) attributes {dimension_semantics = [#tpu.dimension_semantics<arbitrary>], iteration_bounds = array<i64: 1>, scalar_prefetch = 0 : i64, scratch_operands = 0 : i64, tpu.core_type = #tpu.core_type<tc>, window_params = [{pipeline_mode = #tpu.pipeline_mode<synchronous>, transform_indices = @transform_0, window_bounds = array<i64: 64, 48>}, {pipeline_mode = #tpu.pipeline_mode<synchronous>, transform_indices = @transform_1, window_bounds = array<i64: 8, 32>}, {pipeline_mode = #tpu.pipeline_mode<synchronous>, transform_indices = @transform_2, window_bounds = array<i64: 48, 96>}, {pipeline_mode = #tpu.pipeline_mode<synchronous>, transform_indices = @transform_3, window_bounds = array<i64: 32, 96>}, {pipeline_mode = #tpu.pipeline_mode<synchronous>, transform_indices = @transform_4, window_bounds = array<i64: 1, 96>}, {pipeline_mode = #tpu.pipeline_mode<synchronous>, transform_indices = @transform_5, window_bounds = array<i64: 1, 32>}, {pipeline_mode = #tpu.pipeline_mode<synchronous>, transform_indices = @transform_6, window_bounds = array<i64: 32, 128>}, {pipeline_mode = #tpu.pipeline_mode<synchronous>, transform_indices = @transform_7, window_bounds = array<i64: 1, 128>}, {pipeline_mode = #tpu.pipeline_mode<synchronous>, transform_indices = @transform_8, window_bounds = array<i64: 8, 128>}, {pipeline_mode = #tpu.pipeline_mode<synchronous>, transform_indices = @transform_9, window_bounds = array<i64: 8, 32>}]} {
    %c0 = arith.constant 0 : index
    %c0_0 = arith.constant 0 : index
    %0 = vector.load %arg1[%c0, %c0_0] : memref<64x48xf32, #tpu.memory_space<vmem>>, vector<64x48xf32>
    %c0_1 = arith.constant 0 : index
    %c0_2 = arith.constant 0 : index
    %1 = vector.load %arg3[%c0_1, %c0_2] : memref<48x96xf32, #tpu.memory_space<vmem>>, vector<48x96xf32>
    %cst = arith.constant dense<0.000000e+00> : vector<64x96xf32>
    %2 = tpu.matmul %0, %1, %cst {dimension_numbers = #tpu.dot_dimension_numbers<[1], [0], [0], [1], [0, 0, 1, 1], [], []>} : vector<64x48xf32>, vector<48x96xf32>, vector<64x96xf32> -> vector<64x96xf32>
    %c0_3 = arith.constant 0 : index
    %c0_4 = arith.constant 0 : index
    %3 = vector.load %arg5[%c0_3, %c0_4] : memref<1x96xf32, #tpu.memory_space<vmem>>, vector<1x96xf32>
    %4 = vector.broadcast %3 : vector<1x96xf32> to vector<64x96xf32>
    %5 = arith.addf %2, %4 : vector<64x96xf32>
    %6 = vector.extract_strided_slice %5 {offsets = [0, 0], sizes = [64, 32], strides = [1, 1]} : vector<64x96xf32> to vector<64x32xf32>
    %7 = vector.extract_strided_slice %5 {offsets = [0, 32], sizes = [64, 32], strides = [1, 1]} : vector<64x96xf32> to vector<64x32xf32>
    %8 = vector.extract_strided_slice %5 {offsets = [0, 64], sizes = [64, 32], strides = [1, 1]} : vector<64x96xf32> to vector<64x32xf32>
    %c0_5 = arith.constant 0 : index
    %c0_6 = arith.constant 0 : index
    %9 = vector.load %arg4[%c0_5, %c0_6] : memref<32x96xf32, #tpu.memory_space<vmem>>, vector<32x96xf32>
    %c0_7 = arith.constant 0 : index
    %c0_8 = arith.constant 0 : index
    %10 = vector.load %arg6[%c0_7, %c0_8] : memref<1x32xf32, #tpu.memory_space<vmem>>, vector<1x32xf32>
    %c0_9 = arith.constant 0 : index
    %c0_10 = arith.constant 0 : index
    %11 = vector.load %arg2[%c0_9, %c0_10] : memref<8x32xf32, #tpu.memory_space<vmem>>, vector<8x32xf32>
    %cst_11 = arith.constant dense<0.000000e+00> : vector<8x96xf32>
    %12 = tpu.matmul %11, %9, %cst_11 {dimension_numbers = #tpu.dot_dimension_numbers<[1], [0], [0], [1], [0, 0, 1, 1], [], []>} : vector<8x32xf32>, vector<32x96xf32>, vector<8x96xf32> -> vector<8x96xf32>
    %13 = vector.extract_strided_slice %6 {offsets = [0, 0], sizes = [8, 32], strides = [1, 1]} : vector<64x32xf32> to vector<8x32xf32>
    %14 = vector.extract_strided_slice %12 {offsets = [0, 0], sizes = [8, 32], strides = [1, 1]} : vector<8x96xf32> to vector<8x32xf32>
    %15 = arith.addf %13, %14 : vector<8x32xf32>
    %16 = arith.negf %15 : vector<8x32xf32>
    %17 = math.exp %16 : vector<8x32xf32>
    %cst_12 = arith.constant 1.000000e+00 : f32
    %18 = vector.broadcast %cst_12 : f32 to vector<8x32xf32>
    %19 = arith.addf %18, %17 : vector<8x32xf32>
    %20 = arith.divf %18, %19 : vector<8x32xf32>
    %21 = vector.extract_strided_slice %7 {offsets = [0, 0], sizes = [8, 32], strides = [1, 1]} : vector<64x32xf32> to vector<8x32xf32>
    %22 = vector.extract_strided_slice %12 {offsets = [0, 32], sizes = [8, 32], strides = [1, 1]} : vector<8x96xf32> to vector<8x32xf32>
    %23 = arith.addf %21, %22 : vector<8x32xf32>
    %24 = arith.negf %23 : vector<8x32xf32>
    %25 = math.exp %24 : vector<8x32xf32>
    %cst_13 = arith.constant 1.000000e+00 : f32
    %26 = vector.broadcast %cst_13 : f32 to vector<8x32xf32>
    %27 = arith.addf %26, %25 : vector<8x32xf32>
    %28 = arith.divf %26, %27 : vector<8x32xf32>
    %29 = vector.extract_strided_slice %8 {offsets = [0, 0], sizes = [8, 32], strides = [1, 1]} : vector<64x32xf32> to vector<8x32xf32>
    %30 = vector.extract_strided_slice %12 {offsets = [0, 64], sizes = [8, 32], strides = [1, 1]} : vector<8x96xf32> to vector<8x32xf32>
    %31 = vector.broadcast %10 : vector<1x32xf32> to vector<8x32xf32>
    %32 = arith.addf %30, %31 : vector<8x32xf32>
    %33 = arith.mulf %20, %32 : vector<8x32xf32>
    %34 = arith.addf %29, %33 : vector<8x32xf32>
    %35 = math.tanh %34 : vector<8x32xf32>
    %36 = arith.subf %11, %35 : vector<8x32xf32>
    %37 = arith.mulf %28, %36 : vector<8x32xf32>
    %38 = arith.addf %35, %37 : vector<8x32xf32>
    %cst_14 = arith.constant dense<0.000000e+00> : vector<8x96xf32>
    %39 = tpu.matmul %38, %9, %cst_14 {dimension_numbers = #tpu.dot_dimension_numbers<[1], [0], [0], [1], [0, 0, 1, 1], [], []>} : vector<8x32xf32>, vector<32x96xf32>, vector<8x96xf32> -> vector<8x96xf32>
    %40 = vector.extract_strided_slice %6 {offsets = [8, 0], sizes = [8, 32], strides = [1, 1]} : vector<64x32xf32> to vector<8x32xf32>
    %41 = vector.extract_strided_slice %39 {offsets = [0, 0], sizes = [8, 32], strides = [1, 1]} : vector<8x96xf32> to vector<8x32xf32>
    %42 = arith.addf %40, %41 : vector<8x32xf32>
    %43 = arith.negf %42 : vector<8x32xf32>
    %44 = math.exp %43 : vector<8x32xf32>
    %cst_15 = arith.constant 1.000000e+00 : f32
    %45 = vector.broadcast %cst_15 : f32 to vector<8x32xf32>
    %46 = arith.addf %45, %44 : vector<8x32xf32>
    %47 = arith.divf %45, %46 : vector<8x32xf32>
    %48 = vector.extract_strided_slice %7 {offsets = [8, 0], sizes = [8, 32], strides = [1, 1]} : vector<64x32xf32> to vector<8x32xf32>
    %49 = vector.extract_strided_slice %39 {offsets = [0, 32], sizes = [8, 32], strides = [1, 1]} : vector<8x96xf32> to vector<8x32xf32>
    %50 = arith.addf %48, %49 : vector<8x32xf32>
    %51 = arith.negf %50 : vector<8x32xf32>
    %52 = math.exp %51 : vector<8x32xf32>
    %cst_16 = arith.constant 1.000000e+00 : f32
    %53 = vector.broadcast %cst_16 : f32 to vector<8x32xf32>
    %54 = arith.addf %53, %52 : vector<8x32xf32>
    %55 = arith.divf %53, %54 : vector<8x32xf32>
    %56 = vector.extract_strided_slice %8 {offsets = [8, 0], sizes = [8, 32], strides = [1, 1]} : vector<64x32xf32> to vector<8x32xf32>
    %57 = vector.extract_strided_slice %39 {offsets = [0, 64], sizes = [8, 32], strides = [1, 1]} : vector<8x96xf32> to vector<8x32xf32>
    %58 = vector.broadcast %10 : vector<1x32xf32> to vector<8x32xf32>
    %59 = arith.addf %57, %58 : vector<8x32xf32>
    %60 = arith.mulf %47, %59 : vector<8x32xf32>
    %61 = arith.addf %56, %60 : vector<8x32xf32>
    %62 = math.tanh %61 : vector<8x32xf32>
    %63 = arith.subf %38, %62 : vector<8x32xf32>
    %64 = arith.mulf %55, %63 : vector<8x32xf32>
    %65 = arith.addf %62, %64 : vector<8x32xf32>
    %cst_17 = arith.constant dense<0.000000e+00> : vector<8x96xf32>
    %66 = tpu.matmul %65, %9, %cst_17 {dimension_numbers = #tpu.dot_dimension_numbers<[1], [0], [0], [1], [0, 0, 1, 1], [], []>} : vector<8x32xf32>, vector<32x96xf32>, vector<8x96xf32> -> vector<8x96xf32>
    %67 = vector.extract_strided_slice %6 {offsets = [16, 0], sizes = [8, 32], strides = [1, 1]} : vector<64x32xf32> to vector<8x32xf32>
    %68 = vector.extract_strided_slice %66 {offsets = [0, 0], sizes = [8, 32], strides = [1, 1]} : vector<8x96xf32> to vector<8x32xf32>
    %69 = arith.addf %67, %68 : vector<8x32xf32>
    %70 = arith.negf %69 : vector<8x32xf32>
    %71 = math.exp %70 : vector<8x32xf32>
    %cst_18 = arith.constant 1.000000e+00 : f32
    %72 = vector.broadcast %cst_18 : f32 to vector<8x32xf32>
    %73 = arith.addf %72, %71 : vector<8x32xf32>
    %74 = arith.divf %72, %73 : vector<8x32xf32>
    %75 = vector.extract_strided_slice %7 {offsets = [16, 0], sizes = [8, 32], strides = [1, 1]} : vector<64x32xf32> to vector<8x32xf32>
    %76 = vector.extract_strided_slice %66 {offsets = [0, 32], sizes = [8, 32], strides = [1, 1]} : vector<8x96xf32> to vector<8x32xf32>
    %77 = arith.addf %75, %76 : vector<8x32xf32>
    %78 = arith.negf %77 : vector<8x32xf32>
    %79 = math.exp %78 : vector<8x32xf32>
    %cst_19 = arith.constant 1.000000e+00 : f32
    %80 = vector.broadcast %cst_19 : f32 to vector<8x32xf32>
    %81 = arith.addf %80, %79 : vector<8x32xf32>
    %82 = arith.divf %80, %81 : vector<8x32xf32>
    %83 = vector.extract_strided_slice %8 {offsets = [16, 0], sizes = [8, 32], strides = [1, 1]} : vector<64x32xf32> to vector<8x32xf32>
    %84 = vector.extract_strided_slice %66 {offsets = [0, 64], sizes = [8, 32], strides = [1, 1]} : vector<8x96xf32> to vector<8x32xf32>
    %85 = vector.broadcast %10 : vector<1x32xf32> to vector<8x32xf32>
    %86 = arith.addf %84, %85 : vector<8x32xf32>
    %87 = arith.mulf %74, %86 : vector<8x32xf32>
    %88 = arith.addf %83, %87 : vector<8x32xf32>
    %89 = math.tanh %88 : vector<8x32xf32>
    %90 = arith.subf %65, %89 : vector<8x32xf32>
    %91 = arith.mulf %82, %90 : vector<8x32xf32>
    %92 = arith.addf %89, %91 : vector<8x32xf32>
    %cst_20 = arith.constant dense<0.000000e+00> : vector<8x96xf32>
    %93 = tpu.matmul %92, %9, %cst_20 {dimension_numbers = #tpu.dot_dimension_numbers<[1], [0], [0], [1], [0, 0, 1, 1], [], []>} : vector<8x32xf32>, vector<32x96xf32>, vector<8x96xf32> -> vector<8x96xf32>
    %94 = vector.extract_strided_slice %6 {offsets = [24, 0], sizes = [8, 32], strides = [1, 1]} : vector<64x32xf32> to vector<8x32xf32>
    %95 = vector.extract_strided_slice %93 {offsets = [0, 0], sizes = [8, 32], strides = [1, 1]} : vector<8x96xf32> to vector<8x32xf32>
    %96 = arith.addf %94, %95 : vector<8x32xf32>
    %97 = arith.negf %96 : vector<8x32xf32>
    %98 = math.exp %97 : vector<8x32xf32>
    %cst_21 = arith.constant 1.000000e+00 : f32
    %99 = vector.broadcast %cst_21 : f32 to vector<8x32xf32>
    %100 = arith.addf %99, %98 : vector<8x32xf32>
    %101 = arith.divf %99, %100 : vector<8x32xf32>
    %102 = vector.extract_strided_slice %7 {offsets = [24, 0], sizes = [8, 32], strides = [1, 1]} : vector<64x32xf32> to vector<8x32xf32>
    %103 = vector.extract_strided_slice %93 {offsets = [0, 32], sizes = [8, 32], strides = [1, 1]} : vector<8x96xf32> to vector<8x32xf32>
    %104 = arith.addf %102, %103 : vector<8x32xf32>
    %105 = arith.negf %104 : vector<8x32xf32>
    %106 = math.exp %105 : vector<8x32xf32>
    %cst_22 = arith.constant 1.000000e+00 : f32
    %107 = vector.broadcast %cst_22 : f32 to vector<8x32xf32>
    %108 = arith.addf %107, %106 : vector<8x32xf32>
    %109 = arith.divf %107, %108 : vector<8x32xf32>
    %110 = vector.extract_strided_slice %8 {offsets = [24, 0], sizes = [8, 32], strides = [1, 1]} : vector<64x32xf32> to vector<8x32xf32>
    %111 = vector.extract_strided_slice %93 {offsets = [0, 64], sizes = [8, 32], strides = [1, 1]} : vector<8x96xf32> to vector<8x32xf32>
    %112 = vector.broadcast %10 : vector<1x32xf32> to vector<8x32xf32>
    %113 = arith.addf %111, %112 : vector<8x32xf32>
    %114 = arith.mulf %101, %113 : vector<8x32xf32>
    %115 = arith.addf %110, %114 : vector<8x32xf32>
    %116 = math.tanh %115 : vector<8x32xf32>
    %117 = arith.subf %92, %116 : vector<8x32xf32>
    %118 = arith.mulf %109, %117 : vector<8x32xf32>
    %119 = arith.addf %116, %118 : vector<8x32xf32>
    %cst_23 = arith.constant dense<0.000000e+00> : vector<8x96xf32>
    %120 = tpu.matmul %119, %9, %cst_23 {dimension_numbers = #tpu.dot_dimension_numbers<[1], [0], [0], [1], [0, 0, 1, 1], [], []>} : vector<8x32xf32>, vector<32x96xf32>, vector<8x96xf32> -> vector<8x96xf32>
    %121 = vector.extract_strided_slice %6 {offsets = [32, 0], sizes = [8, 32], strides = [1, 1]} : vector<64x32xf32> to vector<8x32xf32>
    %122 = vector.extract_strided_slice %120 {offsets = [0, 0], sizes = [8, 32], strides = [1, 1]} : vector<8x96xf32> to vector<8x32xf32>
    %123 = arith.addf %121, %122 : vector<8x32xf32>
    %124 = arith.negf %123 : vector<8x32xf32>
    %125 = math.exp %124 : vector<8x32xf32>
    %cst_24 = arith.constant 1.000000e+00 : f32
    %126 = vector.broadcast %cst_24 : f32 to vector<8x32xf32>
    %127 = arith.addf %126, %125 : vector<8x32xf32>
    %128 = arith.divf %126, %127 : vector<8x32xf32>
    %129 = vector.extract_strided_slice %7 {offsets = [32, 0], sizes = [8, 32], strides = [1, 1]} : vector<64x32xf32> to vector<8x32xf32>
    %130 = vector.extract_strided_slice %120 {offsets = [0, 32], sizes = [8, 32], strides = [1, 1]} : vector<8x96xf32> to vector<8x32xf32>
    %131 = arith.addf %129, %130 : vector<8x32xf32>
    %132 = arith.negf %131 : vector<8x32xf32>
    %133 = math.exp %132 : vector<8x32xf32>
    %cst_25 = arith.constant 1.000000e+00 : f32
    %134 = vector.broadcast %cst_25 : f32 to vector<8x32xf32>
    %135 = arith.addf %134, %133 : vector<8x32xf32>
    %136 = arith.divf %134, %135 : vector<8x32xf32>
    %137 = vector.extract_strided_slice %8 {offsets = [32, 0], sizes = [8, 32], strides = [1, 1]} : vector<64x32xf32> to vector<8x32xf32>
    %138 = vector.extract_strided_slice %120 {offsets = [0, 64], sizes = [8, 32], strides = [1, 1]} : vector<8x96xf32> to vector<8x32xf32>
    %139 = vector.broadcast %10 : vector<1x32xf32> to vector<8x32xf32>
    %140 = arith.addf %138, %139 : vector<8x32xf32>
    %141 = arith.mulf %128, %140 : vector<8x32xf32>
    %142 = arith.addf %137, %141 : vector<8x32xf32>
    %143 = math.tanh %142 : vector<8x32xf32>
    %144 = arith.subf %119, %143 : vector<8x32xf32>
    %145 = arith.mulf %136, %144 : vector<8x32xf32>
    %146 = arith.addf %143, %145 : vector<8x32xf32>
    %cst_26 = arith.constant dense<0.000000e+00> : vector<8x96xf32>
    %147 = tpu.matmul %146, %9, %cst_26 {dimension_numbers = #tpu.dot_dimension_numbers<[1], [0], [0], [1], [0, 0, 1, 1], [], []>} : vector<8x32xf32>, vector<32x96xf32>, vector<8x96xf32> -> vector<8x96xf32>
    %148 = vector.extract_strided_slice %6 {offsets = [40, 0], sizes = [8, 32], strides = [1, 1]} : vector<64x32xf32> to vector<8x32xf32>
    %149 = vector.extract_strided_slice %147 {offsets = [0, 0], sizes = [8, 32], strides = [1, 1]} : vector<8x96xf32> to vector<8x32xf32>
    %150 = arith.addf %148, %149 : vector<8x32xf32>
    %151 = arith.negf %150 : vector<8x32xf32>
    %152 = math.exp %151 : vector<8x32xf32>
    %cst_27 = arith.constant 1.000000e+00 : f32
    %153 = vector.broadcast %cst_27 : f32 to vector<8x32xf32>
    %154 = arith.addf %153, %152 : vector<8x32xf32>
    %155 = arith.divf %153, %154 : vector<8x32xf32>
    %156 = vector.extract_strided_slice %7 {offsets = [40, 0], sizes = [8, 32], strides = [1, 1]} : vector<64x32xf32> to vector<8x32xf32>
    %157 = vector.extract_strided_slice %147 {offsets = [0, 32], sizes = [8, 32], strides = [1, 1]} : vector<8x96xf32> to vector<8x32xf32>
    %158 = arith.addf %156, %157 : vector<8x32xf32>
    %159 = arith.negf %158 : vector<8x32xf32>
    %160 = math.exp %159 : vector<8x32xf32>
    %cst_28 = arith.constant 1.000000e+00 : f32
    %161 = vector.broadcast %cst_28 : f32 to vector<8x32xf32>
    %162 = arith.addf %161, %160 : vector<8x32xf32>
    %163 = arith.divf %161, %162 : vector<8x32xf32>
    %164 = vector.extract_strided_slice %8 {offsets = [40, 0], sizes = [8, 32], strides = [1, 1]} : vector<64x32xf32> to vector<8x32xf32>
    %165 = vector.extract_strided_slice %147 {offsets = [0, 64], sizes = [8, 32], strides = [1, 1]} : vector<8x96xf32> to vector<8x32xf32>
    %166 = vector.broadcast %10 : vector<1x32xf32> to vector<8x32xf32>
    %167 = arith.addf %165, %166 : vector<8x32xf32>
    %168 = arith.mulf %155, %167 : vector<8x32xf32>
    %169 = arith.addf %164, %168 : vector<8x32xf32>
    %170 = math.tanh %169 : vector<8x32xf32>
    %171 = arith.subf %146, %170 : vector<8x32xf32>
    %172 = arith.mulf %163, %171 : vector<8x32xf32>
    %173 = arith.addf %170, %172 : vector<8x32xf32>
    %cst_29 = arith.constant dense<0.000000e+00> : vector<8x96xf32>
    %174 = tpu.matmul %173, %9, %cst_29 {dimension_numbers = #tpu.dot_dimension_numbers<[1], [0], [0], [1], [0, 0, 1, 1], [], []>} : vector<8x32xf32>, vector<32x96xf32>, vector<8x96xf32> -> vector<8x96xf32>
    %175 = vector.extract_strided_slice %6 {offsets = [48, 0], sizes = [8, 32], strides = [1, 1]} : vector<64x32xf32> to vector<8x32xf32>
    %176 = vector.extract_strided_slice %174 {offsets = [0, 0], sizes = [8, 32], strides = [1, 1]} : vector<8x96xf32> to vector<8x32xf32>
    %177 = arith.addf %175, %176 : vector<8x32xf32>
    %178 = arith.negf %177 : vector<8x32xf32>
    %179 = math.exp %178 : vector<8x32xf32>
    %cst_30 = arith.constant 1.000000e+00 : f32
    %180 = vector.broadcast %cst_30 : f32 to vector<8x32xf32>
    %181 = arith.addf %180, %179 : vector<8x32xf32>
    %182 = arith.divf %180, %181 : vector<8x32xf32>
    %183 = vector.extract_strided_slice %7 {offsets = [48, 0], sizes = [8, 32], strides = [1, 1]} : vector<64x32xf32> to vector<8x32xf32>
    %184 = vector.extract_strided_slice %174 {offsets = [0, 32], sizes = [8, 32], strides = [1, 1]} : vector<8x96xf32> to vector<8x32xf32>
    %185 = arith.addf %183, %184 : vector<8x32xf32>
    %186 = arith.negf %185 : vector<8x32xf32>
    %187 = math.exp %186 : vector<8x32xf32>
    %cst_31 = arith.constant 1.000000e+00 : f32
    %188 = vector.broadcast %cst_31 : f32 to vector<8x32xf32>
    %189 = arith.addf %188, %187 : vector<8x32xf32>
    %190 = arith.divf %188, %189 : vector<8x32xf32>
    %191 = vector.extract_strided_slice %8 {offsets = [48, 0], sizes = [8, 32], strides = [1, 1]} : vector<64x32xf32> to vector<8x32xf32>
    %192 = vector.extract_strided_slice %174 {offsets = [0, 64], sizes = [8, 32], strides = [1, 1]} : vector<8x96xf32> to vector<8x32xf32>
    %193 = vector.broadcast %10 : vector<1x32xf32> to vector<8x32xf32>
    %194 = arith.addf %192, %193 : vector<8x32xf32>
    %195 = arith.mulf %182, %194 : vector<8x32xf32>
    %196 = arith.addf %191, %195 : vector<8x32xf32>
    %197 = math.tanh %196 : vector<8x32xf32>
    %198 = arith.subf %173, %197 : vector<8x32xf32>
    %199 = arith.mulf %190, %198 : vector<8x32xf32>
    %200 = arith.addf %197, %199 : vector<8x32xf32>
    %cst_32 = arith.constant dense<0.000000e+00> : vector<8x96xf32>
    %201 = tpu.matmul %200, %9, %cst_32 {dimension_numbers = #tpu.dot_dimension_numbers<[1], [0], [0], [1], [0, 0, 1, 1], [], []>} : vector<8x32xf32>, vector<32x96xf32>, vector<8x96xf32> -> vector<8x96xf32>
    %202 = vector.extract_strided_slice %6 {offsets = [56, 0], sizes = [8, 32], strides = [1, 1]} : vector<64x32xf32> to vector<8x32xf32>
    %203 = vector.extract_strided_slice %201 {offsets = [0, 0], sizes = [8, 32], strides = [1, 1]} : vector<8x96xf32> to vector<8x32xf32>
    %204 = arith.addf %202, %203 : vector<8x32xf32>
    %205 = arith.negf %204 : vector<8x32xf32>
    %206 = math.exp %205 : vector<8x32xf32>
    %cst_33 = arith.constant 1.000000e+00 : f32
    %207 = vector.broadcast %cst_33 : f32 to vector<8x32xf32>
    %208 = arith.addf %207, %206 : vector<8x32xf32>
    %209 = arith.divf %207, %208 : vector<8x32xf32>
    %210 = vector.extract_strided_slice %7 {offsets = [56, 0], sizes = [8, 32], strides = [1, 1]} : vector<64x32xf32> to vector<8x32xf32>
    %211 = vector.extract_strided_slice %201 {offsets = [0, 32], sizes = [8, 32], strides = [1, 1]} : vector<8x96xf32> to vector<8x32xf32>
    %212 = arith.addf %210, %211 : vector<8x32xf32>
    %213 = arith.negf %212 : vector<8x32xf32>
    %214 = math.exp %213 : vector<8x32xf32>
    %cst_34 = arith.constant 1.000000e+00 : f32
    %215 = vector.broadcast %cst_34 : f32 to vector<8x32xf32>
    %216 = arith.addf %215, %214 : vector<8x32xf32>
    %217 = arith.divf %215, %216 : vector<8x32xf32>
    %218 = vector.extract_strided_slice %8 {offsets = [56, 0], sizes = [8, 32], strides = [1, 1]} : vector<64x32xf32> to vector<8x32xf32>
    %219 = vector.extract_strided_slice %201 {offsets = [0, 64], sizes = [8, 32], strides = [1, 1]} : vector<8x96xf32> to vector<8x32xf32>
    %220 = vector.broadcast %10 : vector<1x32xf32> to vector<8x32xf32>
    %221 = arith.addf %219, %220 : vector<8x32xf32>
    %222 = arith.mulf %209, %221 : vector<8x32xf32>
    %223 = arith.addf %218, %222 : vector<8x32xf32>
    %224 = math.tanh %223 : vector<8x32xf32>
    %225 = arith.subf %200, %224 : vector<8x32xf32>
    %226 = arith.mulf %217, %225 : vector<8x32xf32>
    %227 = arith.addf %224, %226 : vector<8x32xf32>
    %c0_35 = arith.constant 0 : index
    %c0_36 = arith.constant 0 : index
    %228 = vector.load %arg10[%c0_35, %c0_36] : memref<8x32xf32, #tpu.memory_space<vmem>>, vector<8x32xf32>
    tpu.vector_store %arg10[%c0_35, %c0_36], %227 {strides = array<i32>} : memref<8x32xf32, #tpu.memory_space<vmem>>, vector<8x32xf32>,
    %c0_37 = arith.constant 0 : index
    %c0_38 = arith.constant 0 : index
    %229 = vector.load %arg7[%c0_37, %c0_38] : memref<32x128xf32, #tpu.memory_space<vmem>>, vector<32x128xf32>
    %cst_39 = arith.constant dense<0.000000e+00> : vector<8x128xf32>
    %230 = tpu.matmul %38, %229, %cst_39 {dimension_numbers = #tpu.dot_dimension_numbers<[1], [0], [0], [1], [0, 0, 1, 1], [], []>} : vector<8x32xf32>, vector<32x128xf32>, vector<8x128xf32> -> vector<8x128xf32>
    %c0_40 = arith.constant 0 : index
    %c0_41 = arith.constant 0 : index
    %231 = vector.load %arg8[%c0_40, %c0_41] : memref<1x128xf32, #tpu.memory_space<vmem>>, vector<1x128xf32>
    %232 = vector.broadcast %231 : vector<1x128xf32> to vector<8x128xf32>
    %233 = arith.addf %230, %232 : vector<8x128xf32>
    %cst_42 = arith.constant dense<0xFF800000> : vector<8xf32>
    %234 = vector.multi_reduction <maximumf>, %233, %cst_42 [1] : vector<8x128xf32> to vector<8xf32>
    %235 = vector.shape_cast %234 : vector<8xf32> to vector<8x1xf32>
    %236 = vector.broadcast %235 : vector<8x1xf32> to vector<8x128xf32>
    %237 = arith.subf %233, %236 : vector<8x128xf32>
    %238 = math.exp %237 : vector<8x128xf32>
    %cst_43 = arith.constant dense<0.000000e+00> : vector<8xf32>
    %239 = vector.multi_reduction <add>, %238, %cst_43 [1] : vector<8x128xf32> to vector<8xf32>
    %240 = vector.shape_cast %239 : vector<8xf32> to vector<8x1xf32>
    %241 = math.log %240 : vector<8x1xf32>
    %242 = vector.broadcast %241 : vector<8x1xf32> to vector<8x128xf32>
    %243 = arith.subf %237, %242 : vector<8x128xf32>
    %c0_44 = arith.constant 0 : index
    %c0_45 = arith.constant 0 : index
    %244 = vector.load %arg9[%c0_44, %c0_45] : memref<8x128xf32, #tpu.memory_space<vmem>>, vector<8x128xf32>
    tpu.vector_store %arg9[%c0_44, %c0_45], %243 {strides = array<i32>} : memref<8x128xf32, #tpu.memory_space<vmem>>, vector<8x128xf32>,
    return
  }
  func.func @transform_0(%arg0: i32) -> (i32, i32) {
    %c0_i32 = arith.constant 0 : i32
    %c0_i32_0 = arith.constant 0 : i32
    %c0_i32_1 = arith.constant 0 : i32
    return %c0_i32, %c0_i32_0 : i32, i32
  }
  func.func @transform_1(%arg0: i32) -> (i32, i32) {
    %c0_i32 = arith.constant 0 : i32
    %c0_i32_0 = arith.constant 0 : i32
    %c0_i32_1 = arith.constant 0 : i32
    return %c0_i32, %c0_i32_0 : i32, i32
  }
  func.func @transform_2(%arg0: i32) -> (i32, i32) {
    %c0_i32 = arith.constant 0 : i32
    %c0_i32_0 = arith.constant 0 : i32
    %c0_i32_1 = arith.constant 0 : i32
    return %c0_i32, %c0_i32_0 : i32, i32
  }
  func.func @transform_3(%arg0: i32) -> (i32, i32) {
    %c0_i32 = arith.constant 0 : i32
    %c0_i32_0 = arith.constant 0 : i32
    %c0_i32_1 = arith.constant 0 : i32
    return %c0_i32, %c0_i32_0 : i32, i32
  }
  func.func @transform_4(%arg0: i32) -> (i32, i32) {
    %c0_i32 = arith.constant 0 : i32
    %c0_i32_0 = arith.constant 0 : i32
    %c0_i32_1 = arith.constant 0 : i32
    return %c0_i32, %c0_i32_0 : i32, i32
  }
  func.func @transform_5(%arg0: i32) -> (i32, i32) {
    %c0_i32 = arith.constant 0 : i32
    %c0_i32_0 = arith.constant 0 : i32
    %c0_i32_1 = arith.constant 0 : i32
    return %c0_i32, %c0_i32_0 : i32, i32
  }
  func.func @transform_6(%arg0: i32) -> (i32, i32) {
    %c0_i32 = arith.constant 0 : i32
    %c0_i32_0 = arith.constant 0 : i32
    %c0_i32_1 = arith.constant 0 : i32
    return %c0_i32, %c0_i32_0 : i32, i32
  }
  func.func @transform_7(%arg0: i32) -> (i32, i32) {
    %c0_i32 = arith.constant 0 : i32
    %c0_i32_0 = arith.constant 0 : i32
    %c0_i32_1 = arith.constant 0 : i32
    return %c0_i32, %c0_i32_0 : i32, i32
  }
  func.func @transform_8(%arg0: i32) -> (i32, i32) {
    %c0_i32 = arith.constant 0 : i32
    %c0_i32_0 = arith.constant 0 : i32
    %c0_i32_1 = arith.constant 0 : i32
    return %c0_i32, %c0_i32_0 : i32, i32
  }
  func.func @transform_9(%arg0: i32) -> (i32, i32) {
    %c0_i32 = arith.constant 0 : i32
    %c0_i32_0 = arith.constant 0 : i32
    %c0_i32_1 = arith.constant 0 : i32
    return %c0_i32, %c0_i32_0 : i32, i32
  }
}

</mosaic_0001>

<bundles_post_ra>
// kernel: tpu_custom_call.1
= control target key start
LH: loop header
LB: loop body
LE: loop exit
PB: predicated region body
PF: predicated region fallthrough
CT: control target
= control target key end

     0   :  { %15 = vsyncpa [#allocation3], 0  ;;  %s1907_s0 = inlined_call_operand.vmem [shape: f32[64,48], index: 0, kind: input, shape index: {}]   ;;  %s1908_s1 = inlined_call_operand.hbm [shape: f32[8,32], index: 1, kind: input, shape index: {}]   ;;  %s1909_s2 = inlined_call_operand.vmem [shape: f32[48,96], index: 2, kind: input, shape index: {}]   ;;  %s1910_s3 = inlined_call_operand.vmem [shape: f32[32,96], index: 3, kind: input, shape index: {}]   ;;  %s1911_s4 = inlined_call_operand.vmem [shape: f32[1,96], index: 4, kind: input, shape index: {}]   ;;  %s1912_s5 = inlined_call_operand.vmem [shape: f32[1,32], index: 5, kind: input, shape index: {}]   ;;  %s1913_s6 = inlined_call_operand.vmem [shape: f32[32,128], index: 6, kind: input, shape index: {}]   ;;  %s1914_s7 = inlined_call_operand.vmem [shape: f32[1,128], index: 7, kind: input, shape index: {}]   ;;  %s1915_s8 = inlined_call_operand.hbm [shape: f32[8,128], index: 8, kind: output, shape index: {0}]   ;;  %s1916_s9 = inlined_call_operand.hbm [shape: f32[8,32], index: 9, kind: output, shape index: {1}]  }
   0x1   :  { %16 = vsyncpa [#allocation4], 0 }
   0x2   :  { %17 = vsyncpa [#allocation7], 0  ;;  %s1588_s30 = smov [#allocation2]   ;;  %s1516_s13 = scalar_lea.hbm %s1908_s1, 128 }
   0x3   :  { %s26_s10 = sshll.u32 %s1588_s30, 4  ;;  %p1517_p0 = scmp.ne.s32.totalorder %s1908_s1, %s1516_s13  ;;  %s27_s10 = int_to_ptr.vmem [resolvable:$true] %s26_s10 }
   0x4   :  { %p1520_p1 = scmp.lt.u32.totalorder %s1516_s13, %s1908_s1 }
   0x6   :  { %p1522_p2 = pnand %p1520_p1, %p1517_p0 }
   0x8   :  { %1525 = shalt.err (!%p1522_p2)
}
   0x9   :  { %s1526_s18 = scalar_lea.vmem %s27_s10, 128  ;;  %p1531_p4 = scmp.lt.s32.totalorder %s27_s10, %s27_s10 }
   0xa   :  { %p1527_p3 = scmp.ne.s32.totalorder %s27_s10, %s1526_s18  ;;  %p1532_p5 = scmp.lt.s32.totalorder %s1526_s18, %s1526_s18 }
   0xc   :  { %p1533_p6 = por %p1532_p5, %p1531_p4 }
   0xe   :  { %p1534_p7 = pnand %p1533_p6, %p1527_p3 }
  0x10   :  { %1537 = shalt.err (!%p1534_p7)
}
  0x11   :  { %29 = dma.hbm_to_vmem [thread:$0]  %s1908_s1, 128, %s27_s10, [#allocation3]  }
  0x12   :  { %1582 = dma.done.wait [#allocation3], 128  }
  0x13   :  { %1583 = vsyncadd [#allocation3], 4294967168  ;;  %v1589_v0 = vmov 0.0|0.0   ;;  %vm1590_vm0 = vmmov 0   ;;  %v1591_v1 = vmov 0.0   ;;  %v53_v2 = vld [vmem:[%s1909_s2] sm:$0xff] }
  0x14   :  { %1401 = vmatprep.subr.bf16.mxu1 %v1589_v0  ;;  %1298 = vmatprep.mubr.msk.f32.mxu1 %vm1590_vm0, %v1591_v1  ;;  %v54_v3 = vld [vmem:[%s1909_s2 + $0x8] sm:$0xff]  ;;  %v196_v4 = vld [vmem:[%s1910_s3] sm:$0xff]  ;;  %v55_v7 = vld [vmem:[%s1909_s2 + $0x10] sm:$0xff]  ;;  %vm66_vm1 = vcmask 392192   ;;  %vm202_vm2 = vcmask 261120   ;;  %s1594_s25 = smov 96  }
  0x15   :  { %v1389_v5 = vpack.c.bf16 %v54_v3, %v53_v2  ;;  %v197_v6 = vld [vmem:[%s1910_s3 + $0x8] sm:$0xff]  ;;  %v56_v8 = vld [vmem:[%s1909_s2 + $0x18] sm:$0xff]  ;;  %v198_v11 = vld [vmem:[%s1910_s3 + $0x10] sm:$0xff] }
  0x16   :  { %v1680_v9 = vpack.c.bf16 %v197_v6, %v196_v4  ;;  %v1393_v10 = vpack.c.bf16 %v56_v8, %v55_v7  ;;  %v199_v12 = vld [vmem:[%s1910_s3 + $0x18] sm:$0xff]  ;;  %v57_v13 = vld [vmem:[%s1909_s2 + $0x20] sm:$0xff]  ;;  %v58_v14 = vld [vmem:[%s1909_s2 + $0x28] sm:$0xff]  ;;  %s1592_s2 = smov 64  }
  0x17   :  { %1390 = vmatprep.subr.bf16.mxu0 %v1389_v5  ;;  %v45_v15 = vld [vmem:[%s1907_s0] sm:$0xff]  ;;  %v1698_v16 = vpack.c.bf16 %v199_v12, %v198_v11  ;;  %v1397_v18 = vpack.c.bf16 %v58_v14, %v57_v13  ;;  %v46_v20 = vld [vmem:[%s1907_s0 + $0x8] sm:$0xff]  ;;  %v47_v61 = vld [vmem:[%s1907_s0 + $0x10] sm:$0xff] }
  0x18   :  { %1403 = vmatpush3.bf16.msra.mxu1 %v1680_v9  ;;  %1392 = vmatpush3.bf16.msra.mxu0 %v1389_v5  ;;  %v1190_v17 = vld [vmem:[%s1912_s5] ss:$0 sm:$0xff]  ;;  %v48_v62 = vld [vmem:[%s1907_s0 + $0x18] sm:$0xff] }
  0x19   :  { %1404 = vmatprep.subr.bf16.mxu1 %v1589_v0  ;;  %1394 = vmatprep.subr.bf16.mxu0 %v1393_v10  ;;  %v201_v19 = vld [vmem:[#allocation2] sm:$0xff] }
  0x1a   :  { %1278 = vmatprep.mubr.msk.f32.mxu0 %vm66_vm1, %v45_v15  ;;  %288 = vrot.lane.b32.xlu0 %v1190_v17, %s1592_s2  ;;  %v1731_v27 = vld [vmem:[%s1911_s4] ss:$0 sm:$0xff]  ;;  %s1593_s4 = smov 32  }
  0x1c   :  { %1406 = vmatpush3.bf16.msra.mxu1 %v1698_v16  ;;  %1396 = vmatpush3.bf16.msra.mxu0 %v1393_v10 }
  0x1d   :  { %1398 = vmatprep.subr.bf16.mxu0 %v1397_v18  ;;  %1407 = vmatprep.subr.bf16.mxu1 %v1589_v0 }
  0x1f   :  { %1299 = vmatmul.mubr.msk.f32.vlgmr.msra.gmra.mrb[0].mxu1 %vm202_vm2, %v201_v19 }
  0x20   :  { %1400 = vmatpush3.bf16.msra.mxu0 %v1397_v18  ;;  %1409 = vmatpush3.bf16.msra.mxu1 %v1680_v9 }
  0x21   :  { %1410 = vmatprep.subr.bf16.mxu1 %v1589_v0  ;;  %1309 = vmatprep.mubr.msk.f32.mxu1 %vm1590_vm0, %v1591_v1 }
  0x22   :  { %1419 = vmatprep.subr.bf16.mxu0 %v1589_v0 }
  0x23   :  { %1279 = vmatmul.mubr.msk.f32.vlgmr.msra.gmra.mrb[0].mxu0 %vm66_vm1, %v46_v20 }
  0x24   :  { %1412 = vmatpush3.bf16.msra.mxu1 %v1698_v16  ;;  %1421 = vmatpush3.bf16.msra.mxu0 %v1680_v9 }
  0x25   :  { %1413 = vmatprep.subr.bf16.mxu1 %v1589_v0  ;;  %1422 = vmatprep.subr.bf16.mxu0 %v1589_v0 }
  0x26   :  { %1281 = vmatprep.mubr.msk.f32.mxu0 %vm66_vm1, %v47_v61 }
  0x27   :  { %1282 = vmatmul.mubr.msk.f32.gmra.mrb[2].mxu0 %vm66_vm1, %v48_v62 }
  0x28   :  { %1424 = vmatpush3.bf16.msra.mxu0 %v1698_v16 }
  0x29   :  { %1431 = vmatprep.subr.bf16.mxu0 %v1589_v0 }
  0x8c   :  { %v1724_v21 = vpop.permute.xlu0 %288 }
  0xf2   :  { %v272_v22 = vpop.f32.mrb[0].mxu1 }
  0xf3   :  { %v291_v23 = vadd.f32 %v1724_v21, %v272_v22  ;;  %v1300_v24 = vpop.f32.mrb[1].mxu1 }
  0xf5   :  { %293 = vrot.lane.b32.xlu0 %v291_v23, %s1592_s2 }
  0xf6   :  { %v1280_v25 = vpop.f32.mrb[0].mxu0 }
  0xf7   :  { %v157_v26 = vpop.f32.mrb[1].mxu0  ;;  %v163_v49 = vadd.f32 %v1280_v25, %v1731_v27 }
  0xf8   :  { %v158_v28 = vadd.f32 %v1731_v27, %v157_v26  ;;  %v49_v26 = vld [vmem:[%s1907_s0 + $0x20] sm:$0xff] }
  0xf9   :  { %1284 = vmatprep.mubr.msk.f32.mxu0 %vm66_vm1, %v49_v26 }
  0xfa   :  { %v276_v29 = vadd.f32 %v272_v22, %v158_v28  ;;  %v1283_v5 = vpop.f32.mrb[2].mxu0 }
  0xfb   :  { %v167_v6 = vpop.f32.mrb[3].mxu0 }
  0xfc   :  { %v1189_v30 = vmul.f32 -1.442695, %v276_v29  ;;  %v168_v12 = vadd.f32 %v1731_v27, %v167_v6  ;;  %v51_v29 = vld [vmem:[%s1907_s0 + $0x30] sm:$0xff] }
  0xfe   :  { %1464 = vpow2.f32 %v1189_v30  ;;  %v52_v30 = vld [vmem:[%s1907_s0 + $0x38] sm:$0xff] }
 0x108   :  { %v1465_v31 = vpop.eup %1464 }
 0x109   :  { %v280_v32 = vadd.f32 1.0, %v1465_v31 }
 0x10b   :  { %1466 = vrcp.f32 %v280_v32 }
 0x115   :  { %v1467_v33 = vpop.eup %1466 }
 0x167   :  { %v294_v34 = vpop.permute.xlu0 %293 }
 0x168   :  { %v296_v35 = vmul.f32 %v1467_v33, %v294_v34 }
 0x16a   :  { %298 = vrot.lane.b32.xlu1 %v296_v35, %s1592_s2 }
 0x1dc   :  { %v299_v36 = vpop.permute.xlu1 %298 }
 0x1dd   :  { %v301_v37 = vadd.f32 %v299_v36, %v158_v28  ;;  %v50_v28 = vld [vmem:[%s1907_s0 + $0x28] sm:$0xff] }
 0x1de   :  { %1285 = vmatmul.mubr.msk.f32.gmra.mrb[4].mxu0 %vm66_vm1, %v50_v28 }
 0x1df   :  { %1468 = vtanh.f32 %v301_v37  ;;  %1287 = vmatprep.mubr.msk.f32.mxu0 %vm66_vm1, %v51_v29 }
 0x1e2   :  { %1288 = vmatmul.mubr.msk.f32.gmra.mrb[6].mxu0 %vm66_vm1, %v52_v30 }
 0x1e3   :  { %1331 = vmatprep.mubr.msk.f32.mxu0 %vm1590_vm0, %v1591_v1 }
 0x1e9   :  { %v1469_v38 = vpop.eup %1468 }
 0x1ea   :  { %304 = vrot.lane.b32.xlu1 %v1469_v38, %s1592_s2 }
 0x25c   :  { %v305_v39 = vpop.permute.xlu1 %304 }
 0x25d   :  { %v307_v40 = vsub.f32 %v201_v19, %v305_v39 }
 0x25f   :  { %309 = vrot.lane.b32.xlu0 %v307_v40, %s1593_s4 }
 0x2b1   :  { %v1796_v35 = vpop.f32.mrb[4].mxu0 }
 0x2b2   :  { %v177_v36 = vpop.f32.mrb[5].mxu0 }
 0x2b5   :  { %v1798_v37 = vpop.f32.mrb[6].mxu0 }
 0x2d1   :  { %v310_v41 = vpop.permute.xlu0 %309 }
 0x2d2   :  { %v312_v42 = vmul.f32 %v1467_v33, %v310_v41 }
 0x2d4   :  { %314 = vrot.lane.b32.xlu1 %v312_v42, %s1593_s4 }
 0x346   :  { %v315_v43 = vpop.permute.xlu1 %314 }
 0x347   :  { %v317_v44 = vadd.f32 %v1469_v38, %v315_v43  ;;  %v1800_v38 = vpop.f32.mrb[7].mxu0  ;;  %v173_v43 = vadd.f32 %v1283_v5, %v1731_v27 }
 0x349   :  { %319 = vrot.lane.b32.xlu0 %v317_v44, %s1592_s2 }
 0x3bb   :  { %v1739_v45 = vpop.permute.xlu0 %319 }
 0x3bc   :  { %1310 = vmatmul.mubr.msk.f32.vlgmr.msra.gmra.mrb[2].mxu1 %vm202_vm2, %v1739_v45 }
 0x3bd   :  { %1415 = vmatpush3.bf16.msra.mxu1 %v1680_v9  ;;  %1320 = vmatprep.mubr.msk.f32.mxu1 %vm1590_vm0, %v1591_v1 }
 0x3be   :  { %1416 = vmatprep.subr.bf16.mxu1 %v1589_v0 }
 0x3c1   :  { %1418 = vmatpush3.bf16.msra.mxu1 %v1698_v16 }
 0x3c2   :  { %1425 = vmatprep.subr.bf16.mxu1 %v1589_v0 }
 0x48f   :  { %v389_v46 = vpop.f32.mrb[2].mxu1 }
 0x490   :  { %v400_v47 = vadd.f32 %v389_v46, %v1724_v21  ;;  %v1311_v48 = vpop.f32.mrb[3].mxu1  ;;  %v393_v50 = vadd.f32 %v389_v46, %v163_v49 }
 0x492   :  { %402 = vrot.lane.b32.xlu1 %v400_v47, %s1592_s2  ;;  %v1192_v51 = vmul.f32 -1.442695, %v393_v50 }
 0x494   :  { %1470 = vpow2.f32 %v1192_v51 }
 0x49e   :  { %v1471_v52 = vpop.eup %1470 }
 0x49f   :  { %v397_v53 = vadd.f32 1.0, %v1471_v52 }
 0x4a1   :  { %1472 = vrcp.f32 %v397_v53 }
 0x4ab   :  { %v1473_v54 = vpop.eup %1472 }
 0x504   :  { %v403_v55 = vpop.permute.xlu1 %402 }
 0x505   :  { %v405_v56 = vmul.f32 %v1473_v54, %v403_v55 }
 0x507   :  { %407 = vrot.lane.b32.xlu0 %v405_v56, %s1592_s2 }
 0x579   :  { %v408_v57 = vpop.permute.xlu0 %407 }
 0x57a   :  { %v410_v58 = vadd.f32 %v408_v57, %v163_v49 }
 0x57c   :  { %1474 = vtanh.f32 %v410_v58 }
 0x586   :  { %v1475_v59 = vpop.eup %1474 }
 0x587   :  { %v412_v60 = vsub.f32 %v317_v44, %v1475_v59 }
 0x589   :  { %414 = vrot.lane.b32.xlu1 %v412_v60, %s1594_s25 }
 0x5fb   :  { %v415_v63 = vpop.permute.xlu1 %414 }
 0x5fc   :  { %v417_v2 = vmul.f32 %v1473_v54, %v415_v63 }
 0x5fe   :  { %419 = vrot.lane.b32.xlu0 %v417_v2, %s1593_s4  ;;  %v178_v2 = vadd.f32 %v1731_v27, %v177_v36 }
 0x670   :  { %v420_v3 = vpop.permute.xlu0 %419 }
 0x671   :  { %v422_v4 = vadd.f32 %v1475_v59, %v420_v3 }
 0x673   :  { %424 = vrot.lane.b32.xlu1 %v422_v4, %s1592_s2 }
 0x6e5   :  { %v425_v7 = vpop.permute.xlu1 %424 }
 0x6e6   :  { %1321 = vmatmul.mubr.msk.f32.vlgmr.msra.gmra.mrb[4].mxu1 %vm202_vm2, %v425_v7 }
 0x6e7   :  { %1427 = vmatpush3.bf16.msra.mxu1 %v1680_v9  ;;  %1342 = vmatprep.mubr.msk.f32.mxu1 %vm1590_vm0, %v1591_v1 }
 0x6e8   :  { %1428 = vmatprep.subr.bf16.mxu1 %v1589_v0 }
 0x6eb   :  { %1430 = vmatpush3.bf16.msra.mxu1 %v1698_v16 }
 0x6ec   :  { %1437 = vmatprep.subr.bf16.mxu1 %v1589_v0 }
 0x7b9   :  { %v494_v8 = vpop.f32.mrb[4].mxu1 }
 0x7ba   :  { %v505_v10 = vadd.f32 %v494_v8, %v1724_v21  ;;  %v1322_v11 = vpop.f32.mrb[5].mxu1  ;;  %v498_v13 = vadd.f32 %v494_v8, %v168_v12 }
 0x7bc   :  { %507 = vrot.lane.b32.xlu0 %v505_v10, %s1592_s2  ;;  %v1194_v14 = vmul.f32 -1.442695, %v498_v13 }
 0x7be   :  { %1476 = vpow2.f32 %v1194_v14 }
 0x7c8   :  { %v1477_v15 = vpop.eup %1476 }
 0x7c9   :  { %v502_v17 = vadd.f32 1.0, %v1477_v15 }
 0x7cb   :  { %1478 = vrcp.f32 %v502_v17 }
 0x7d5   :  { %v1479_v18 = vpop.eup %1478 }
 0x82e   :  { %v508_v19 = vpop.permute.xlu0 %507 }
 0x82f   :  { %v510_v20 = vmul.f32 %v1479_v18, %v508_v19 }
 0x831   :  { %512 = vrot.lane.b32.xlu1 %v510_v20, %s1592_s2 }
 0x8a3   :  { %v513_v22 = vpop.permute.xlu1 %512 }
 0x8a4   :  { %v515_v23 = vadd.f32 %v513_v22, %v168_v12 }
 0x8a6   :  { %1480 = vtanh.f32 %v515_v23 }
 0x8b0   :  { %v1481_v24 = vpop.eup %1480 }
 0x8b1   :  { %v517_v25 = vsub.f32 %v422_v4, %v1481_v24 }
 0x8b3   :  { %519 = vrot.lane.b32.xlu0 %v517_v25, %s1594_s25  ;;  %v183_v25 = vadd.f32 %v1796_v35, %v1731_v27 }
 0x925   :  { %v520_v31 = vpop.permute.xlu0 %519 }
 0x926   :  { %v522_v32 = vmul.f32 %v1479_v18, %v520_v31 }
 0x928   :  { %524 = vrot.lane.b32.xlu1 %v522_v32, %s1593_s4 }
 0x99a   :  { %v525_v33 = vpop.permute.xlu1 %524 }
 0x99b   :  { %v527_v34 = vadd.f32 %v1481_v24, %v525_v33 }
 0x99d   :  { %529 = vrot.lane.b32.xlu0 %v527_v34, %s1592_s2 }
 0xa0f   :  { %v530_v39 = vpop.permute.xlu0 %529 }
 0xa10   :  { %1332 = vmatmul.mubr.msk.f32.vlgmr.msra.gmra.mrb[8].mxu0 %vm202_vm2, %v530_v39 }
 0xa11   :  { %1433 = vmatpush3.bf16.msra.mxu0 %v1680_v9  ;;  %1353 = vmatprep.mubr.msk.f32.mxu0 %vm1590_vm0, %v1591_v1 }
 0xa12   :  { %1434 = vmatprep.subr.bf16.mxu0 %v1589_v0 }
 0xa15   :  { %1436 = vmatpush3.bf16.msra.mxu0 %v1698_v16 }
 0xa16   :  { %1443 = vmatprep.subr.bf16.mxu0 %v1589_v0 }
 0xae3   :  { %v599_v40 = vpop.f32.mrb[8].mxu0 }
 0xae4   :  { %v610_v41 = vadd.f32 %v599_v40, %v1724_v21  ;;  %v1333_v42 = vpop.f32.mrb[9].mxu0  ;;  %v603_v44 = vadd.f32 %v599_v40, %v173_v43 }
 0xae5   :  { %v1058_v42 = vld [vmem:[%s1913_s6] sm:$0xff] }
 0xae6   :  { %612 = vrot.lane.b32.xlu1 %v610_v41, %s1592_s2  ;;  %v1196_v46 = vmul.f32 -1.442695, %v603_v44 }
 0xae8   :  { %1482 = vpow2.f32 %v1196_v46  ;;  %v1060_v46 = vld [vmem:[%s1913_s6 + $0x10] sm:$0xff] }
 0xaf2   :  { %v1483_v47 = vpop.eup %1482 }
 0xaf3   :  { %v607_v48 = vadd.f32 1.0, %v1483_v47  ;;  %v1061_v47 = vld [vmem:[%s1913_s6 + $0x18] sm:$0xff] }
 0xaf5   :  { %1484 = vrcp.f32 %v607_v48 }
 0xaff   :  { %v1485_v49 = vpop.eup %1484 }
 0xb58   :  { %v613_v50 = vpop.permute.xlu1 %612 }
 0xb59   :  { %v615_v51 = vmul.f32 %v1485_v49, %v613_v50 }
 0xb5b   :  { %617 = vrot.lane.b32.xlu0 %v615_v51, %s1592_s2 }
 0xbcd   :  { %v618_v52 = vpop.permute.xlu0 %617 }
 0xbce   :  { %v620_v53 = vadd.f32 %v618_v52, %v173_v43  ;;  %v1059_v43 = vld [vmem:[%s1913_s6 + $0x8] sm:$0xff] }
 0xbcf   :  { %v1450_v44 = vpack.c.bf16 %v1059_v43, %v1058_v42 }
 0xbd0   :  { %1486 = vtanh.f32 %v620_v53 }
 0xbda   :  { %v1487_v54 = vpop.eup %1486 }
 0xbdb   :  { %v622_v55 = vsub.f32 %v527_v34, %v1487_v54 }
 0xbdd   :  { %624 = vrot.lane.b32.xlu1 %v622_v55, %s1594_s25  ;;  %v188_v55 = vadd.f32 %v1731_v27, %v1800_v38 }
 0xc4f   :  { %v625_v56 = vpop.permute.xlu1 %624 }
 0xc50   :  { %v627_v57 = vmul.f32 %v1485_v49, %v625_v56  ;;  %v1453_v49 = vpack.c.bf16 %v1061_v47, %v1060_v46 }
 0xc52   :  { %629 = vrot.lane.b32.xlu0 %v627_v57, %s1593_s4 }
 0xcc4   :  { %v630_v58 = vpop.permute.xlu0 %629 }
 0xcc5   :  { %v632_v59 = vadd.f32 %v1487_v54, %v630_v58 }
 0xcc7   :  { %634 = vrot.lane.b32.xlu1 %v632_v59, %s1592_s2 }
 0xd39   :  { %v635_v60 = vpop.permute.xlu1 %634 }
 0xd3a   :  { %1343 = vmatmul.mubr.msk.f32.vlgmr.msra.gmra.mrb[6].mxu1 %vm202_vm2, %v635_v60 }
 0xd3b   :  { %1439 = vmatpush3.bf16.msra.mxu1 %v1680_v9  ;;  %1364 = vmatprep.mubr.msk.f32.mxu1 %vm1590_vm0, %v1591_v1 }
 0xd3c   :  { %1440 = vmatprep.subr.bf16.mxu1 %v1589_v0 }
 0xd3f   :  { %1442 = vmatpush3.bf16.msra.mxu1 %v1698_v16 }
 0xd40   :  { %1449 = vmatprep.subr.bf16.mxu1 %v1589_v0 }
 0xe0d   :  { %v704_v61 = vpop.f32.mrb[6].mxu1 }
 0xe0e   :  { %v715_v62 = vadd.f32 %v704_v61, %v1724_v21  ;;  %v1344_v63 = vpop.f32.mrb[7].mxu1  ;;  %v708_v3 = vadd.f32 %v704_v61, %v178_v2 }
 0xe10   :  { %717 = vrot.lane.b32.xlu0 %v715_v62, %s1592_s2  ;;  %v1198_v4 = vmul.f32 -1.442695, %v708_v3 }
 0xe12   :  { %1488 = vpow2.f32 %v1198_v4 }
 0xe1c   :  { %v1489_v5 = vpop.eup %1488 }
 0xe1d   :  { %v712_v6 = vadd.f32 1.0, %v1489_v5 }
 0xe1f   :  { %1490 = vrcp.f32 %v712_v6 }
 0xe29   :  { %v1491_v7 = vpop.eup %1490 }
 0xe82   :  { %v718_v8 = vpop.permute.xlu0 %717 }
 0xe83   :  { %v720_v10 = vmul.f32 %v1491_v7, %v718_v8 }
 0xe85   :  { %722 = vrot.lane.b32.xlu1 %v720_v10, %s1592_s2  ;;  %v193_v10 = vadd.f32 %v1798_v37, %v1731_v27 }
 0xef7   :  { %v723_v11 = vpop.permute.xlu1 %722 }
 0xef8   :  { %v725_v12 = vadd.f32 %v723_v11, %v178_v2 }
 0xefa   :  { %1492 = vtanh.f32 %v725_v12 }
 0xf04   :  { %v1493_v13 = vpop.eup %1492 }
 0xf05   :  { %v727_v14 = vsub.f32 %v632_v59, %v1493_v13 }
 0xf07   :  { %729 = vrot.lane.b32.xlu0 %v727_v14, %s1594_s25 }
 0xf79   :  { %v730_v15 = vpop.permute.xlu0 %729 }
 0xf7a   :  { %v732_v17 = vmul.f32 %v1491_v7, %v730_v15 }
 0xf7c   :  { %734 = vrot.lane.b32.xlu1 %v732_v17, %s1593_s4 }
 0xfee   :  { %v735_v18 = vpop.permute.xlu1 %734 }
 0xfef   :  { %v737_v19 = vadd.f32 %v1493_v13, %v735_v18 }
 0xff1   :  { %739 = vrot.lane.b32.xlu0 %v737_v19, %s1592_s2 }
0x1063   :  { %v740_v20 = vpop.permute.xlu0 %739 }
0x1064   :  { %1354 = vmatmul.mubr.msk.f32.vlgmr.msra.gmra.mrb[10].mxu0 %vm202_vm2, %v740_v20 }
0x1065   :  { %1445 = vmatpush3.bf16.msra.mxu0 %v1680_v9  ;;  %1375 = vmatprep.mubr.msk.f32.mxu0 %vm1590_vm0, %v1591_v1 }
0x1066   :  { %1446 = vmatprep.subr.bf16.mxu0 %v1589_v0 }
0x1069   :  { %1448 = vmatpush3.bf16.msra.mxu0 %v1698_v16 }
0x1137   :  { %v809_v22 = vpop.f32.mrb[10].mxu0 }
0x1138   :  { %v820_v23 = vadd.f32 %v809_v22, %v1724_v21  ;;  %v1355_v24 = vpop.f32.mrb[11].mxu0  ;;  %v813_v26 = vadd.f32 %v809_v22, %v183_v25 }
0x113a   :  { %822 = vrot.lane.b32.xlu1 %v820_v23, %s1592_s2  ;;  %v1200_v28 = vmul.f32 -1.442695, %v813_v26 }
0x113c   :  { %1494 = vpow2.f32 %v1200_v28 }
0x1146   :  { %v1495_v9 = vpop.eup %1494 }
0x1147   :  { %v817_v29 = vadd.f32 1.0, %v1495_v9 }
0x1149   :  { %1496 = vrcp.f32 %v817_v29 }
0x1153   :  { %v1497_v30 = vpop.eup %1496 }
0x11ac   :  { %v823_v31 = vpop.permute.xlu1 %822 }
0x11ad   :  { %v825_v32 = vmul.f32 %v1497_v30, %v823_v31 }
0x11af   :  { %827 = vrot.lane.b32.xlu0 %v825_v32, %s1592_s2 }
0x1221   :  { %v828_v16 = vpop.permute.xlu0 %827 }
0x1222   :  { %v830_v33 = vadd.f32 %v828_v16, %v183_v25 }
0x1224   :  { %1498 = vtanh.f32 %v830_v33 }
0x122e   :  { %v1499_v34 = vpop.eup %1498 }
0x122f   :  { %v832_v36 = vsub.f32 %v737_v19, %v1499_v34 }
0x1231   :  { %834 = vrot.lane.b32.xlu1 %v832_v36, %s1594_s25 }
0x12a3   :  { %v835_v39 = vpop.permute.xlu1 %834 }
0x12a4   :  { %v837_v35 = vmul.f32 %v1497_v30, %v835_v39 }
0x12a6   :  { %839 = vrot.lane.b32.xlu0 %v837_v35, %s1593_s4 }
0x1318   :  { %v840_v40 = vpop.permute.xlu0 %839 }
0x1319   :  { %v842_v41 = vadd.f32 %v1499_v34, %v840_v40 }
0x131b   :  { %844 = vrot.lane.b32.xlu1 %v842_v41, %s1592_s2 }
0x138d   :  { %v845_v48 = vpop.permute.xlu1 %844 }
0x138e   :  { %1365 = vmatmul.mubr.msk.f32.vlgmr.msra.gmra.mrb[8].mxu1 %vm202_vm2, %v845_v48 }
0x138f   :  { %1451 = vmatpush3.bf16.msra.mxu1 %v1450_v44  ;;  %1386 = vmatprep.mubr.msk.f32.mxu1 %vm1590_vm0, %v1591_v1 }
0x1390   :  { %1452 = vmatprep.subr.bf16.mxu1 %v1589_v0 }
0x1393   :  { %1454 = vmatpush3.bf16.msra.mxu1 %v1453_v49 }
0x1396   :  { %1387 = vmatmul.mubr.msk.f32.vlgmr.msra.gmra.mrb[10].mxu1 %vm202_vm2, %v1739_v45 }
0x1461   :  { %v914_v50 = vpop.f32.mrb[8].mxu1 }
0x1462   :  { %v925_v51 = vadd.f32 %v914_v50, %v1724_v21  ;;  %v1366_v52 = vpop.f32.mrb[9].mxu1  ;;  %v918_v56 = vadd.f32 %v914_v50, %v188_v55 }
0x1464   :  { %927 = vrot.lane.b32.xlu0 %v925_v51, %s1592_s2  ;;  %v1202_v57 = vmul.f32 -1.442695, %v918_v56 }
0x1466   :  { %1500 = vpow2.f32 %v1202_v57 }
0x1469   :  { %v1135_v53 = vpop.f32.mrb[10].mxu1 }
0x146a   :  { %v1388_v54 = vpop.f32.mrb[11].mxu1 }
0x1470   :  { %v1501_v1 = vpop.eup %1500 }
0x1471   :  { %v922_v0 = vadd.f32 1.0, %v1501_v1 }
0x1473   :  { %1502 = vrcp.f32 %v922_v0 }
0x147d   :  { %v1503_v58 = vpop.eup %1502 }
0x14d6   :  { %v928_v59 = vpop.permute.xlu0 %927 }
0x14d7   :  { %v930_v45 = vmul.f32 %v1503_v58, %v928_v59 }
0x14d9   :  { %932 = vrot.lane.b32.xlu1 %v930_v45, %s1592_s2 }
0x154b   :  { %v933_v60 = vpop.permute.xlu1 %932 }
0x154c   :  { %v935_v61 = vadd.f32 %v933_v60, %v188_v55 }
0x154e   :  { %1504 = vtanh.f32 %v935_v61 }
0x1558   :  { %v1505_v62 = vpop.eup %1504 }
0x1559   :  { %v937_v63 = vsub.f32 %v842_v41, %v1505_v62 }
0x155b   :  { %939 = vrot.lane.b32.xlu0 %v937_v63, %s1594_s25 }
0x15cd   :  { %v940_v2 = vpop.permute.xlu0 %939 }
0x15ce   :  { %v942_v38 = vmul.f32 %v1503_v58, %v940_v2 }
0x15d0   :  { %944 = vrot.lane.b32.xlu1 %v942_v38, %s1593_s4 }
0x1642   :  { %v945_v3 = vpop.permute.xlu1 %944 }
0x1643   :  { %v947_v4 = vadd.f32 %v1505_v62, %v945_v3 }
0x1645   :  { %949 = vrot.lane.b32.xlu0 %v947_v4, %s1592_s2 }
0x16b7   :  { %v950_v5 = vpop.permute.xlu0 %949 }
0x16b8   :  { %1376 = vmatmul.mubr.msk.f32.vlgmr.msra.gmra.mrb[12].mxu0 %vm202_vm2, %v950_v5 }
0x178b   :  { %v1019_v6 = vpop.f32.mrb[12].mxu0 }
0x178c   :  { %v1030_v7 = vadd.f32 %v1019_v6, %v1724_v21  ;;  %v1377_v8 = vpop.f32.mrb[13].mxu0  ;;  %v1023_v11 = vadd.f32 %v1019_v6, %v193_v10  ;;  %v1205_v21 = vld [vmem:[%s1914_s7] ss:$0 sm:$0xff]  ;;  %s1595_s7 = smov [#allocation5]  }
0x178d   :  { %v1136_v19 = vadd.f32 %v1205_v21, %v1135_v53  ;;  %s1156_s22 = sshll.u32 %s1595_s7, 4  ;;  %s1157_s22 = int_to_ptr.vmem [resolvable:$true] %s1156_s22 }
0x178e   :  { %1032 = vrot.lane.b32.xlu1 %v1030_v7, %s1592_s2  ;;  %v1204_v12 = vmul.f32 -1.442695, %v1023_v11  ;;  %s1538_s23 = scalar_lea.vmem %s1157_s22, 128  ;;  %p1543_p9 = scmp.lt.s32.totalorder %s1157_s22, %s1157_s22 }
0x178f   :  { %p1539_p8 = scmp.ne.s32.totalorder %s1157_s22, %s1538_s23  ;;  %p1544_p10 = scmp.lt.s32.totalorder %s1538_s23, %s1538_s23 }
0x1790   :  { %1506 = vpow2.f32 %v1204_v12 }
0x1791   :  { %p1545_p11 = por %p1544_p10, %p1543_p9 }
0x1793   :  { %p1546_p12 = pnand %p1545_p11, %p1539_p8 }
0x179a   :  { %v1507_v13 = vpop.eup %1506 }
0x179b   :  { %v1027_v14 = vadd.f32 1.0, %v1507_v13 }
0x179d   :  { %1508 = vrcp.f32 %v1027_v14 }
0x17a7   :  { %v1509_v15 = vpop.eup %1508 }
0x1800   :  { %v1033_v17 = vpop.permute.xlu1 %1032 }
0x1801   :  { %v1035_v18 = vmul.f32 %v1509_v15, %v1033_v17 }
0x1803   :  { %1037 = vrot.lane.b32.xlu0 %v1035_v18, %s1592_s2 }
0x1822   :  { %1139 = vmax.xlane.f32.xlu0 %v1136_v19 }
0x1875   :  { %v1038_v20 = vpop.permute.xlu0 %1037 }
0x1876   :  { %v1040_v22 = vadd.f32 %v1038_v20, %v193_v10 }
0x1878   :  { %1510 = vtanh.f32 %v1040_v22 }
0x1882   :  { %v1511_v27 = vpop.eup %1510 }
0x1883   :  { %v1042_v37 = vsub.f32 %v947_v4, %v1511_v27 }
0x1885   :  { %1044 = vrot.lane.b32.xlu1 %v1042_v37, %s1594_s25 }
0x18af   :  { %v1140_v25 = vpop.xlane.xlu0 %1139 }
0x18b0   :  { %v1141_v26 = vsub.f32 %v1136_v19, %v1140_v25 }
0x18b2   :  { %v1142_v28 = vmul.f32 1.442695, %v1141_v26 }
0x18b4   :  { %1512 = vpow2.f32 %v1142_v28 }
0x18be   :  { %v1513_v9 = vpop.eup %1512 }
0x18f7   :  { %v1045_v23 = vpop.permute.xlu1 %1044 }
0x18f8   :  { %v1047_v24 = vmul.f32 %v1509_v15, %v1045_v23 }
0x18fa   :  { %1049 = vrot.lane.b32.xlu1 %v1047_v24, %s1593_s4 }
0x191e   :  { %1144 = vadd.xlane.f32.xlu1 %v1513_v9 }
0x196c   :  { %v1050_v29 = vpop.permute.xlu1 %1049 }
0x196d   :  { %v1052_v30 = vadd.f32 %v1511_v27, %v1050_v29 }
0x196f   :  { %1054 = vrot.lane.b32.xlu0 %v1052_v30, %s1592_s2 }
0x19ab   :  { %v1145_v31 = vpop.xlane.xlu1 %1144 }
0x19ac   :  { %1514 = vlog2.f32 %v1145_v31 }
0x19b6   :  { %v1515_v32 = vpop.eup %1514 }
0x19b7   :  { %v1147_v16 = vmul.f32 0.6931472, %v1515_v32 }
0x19b9   :  { %v1148_v33 = vsub.f32 %v1141_v26, %v1147_v16 }
0x19bb   :  { %1149 = vst [vmem:[#allocation5] sm:$0xff] %v1148_v33 }
0x19bc   :  { %1549 = shalt.err (!%p1546_p12)
}
0x19bd   :  { %s1550_s2 = scalar_lea.hbm %s1915_s8, 128 }
0x19be   :  { %p1551_p13 = scmp.ne.s32.totalorder %s1915_s8, %s1550_s2  ;;  %p1554_p0 = scmp.lt.u32.totalorder %s1550_s2, %s1915_s8 }
0x19c0   :  { %p1556_p1 = pnand %p1554_p0, %p1551_p13 }
0x19c2   :  { %1559 = shalt.err (!%p1556_p1)
}
0x19c3   :  { %1159 = dma.vmem_to_hbm [thread:$0]  %s1157_s22, 128, %s1915_s8, [#allocation4]  }
0x19c4   :  { %s1596_s30 = smov [#allocation6]  }
0x19c5   :  { %s1166_s10 = sshll.u32 %s1596_s30, 4  ;;  %s1167_s10 = int_to_ptr.vmem [resolvable:$true] %s1166_s10 }
0x19c6   :  { %s1560_s11 = scalar_lea.vmem %s1167_s10, 128  ;;  %p1565_p3 = scmp.lt.s32.totalorder %s1167_s10, %s1167_s10 }
0x19c7   :  { %p1561_p2 = scmp.ne.s32.totalorder %s1167_s10, %s1560_s11  ;;  %p1566_p4 = scmp.lt.s32.totalorder %s1560_s11, %s1560_s11 }
0x19c9   :  { %p1567_p5 = por %p1566_p4, %p1565_p3 }
0x19cb   :  { %p1568_p6 = pnand %p1567_p5, %p1561_p2 }
0x19e1   :  { %v1055_v34 = vpop.permute.xlu0 %1054 }
0x19e2   :  { %1057 = vst.msk [vmem:[#allocation6] sm:$0xff] %vm202_vm2, %v1055_v34 }
0x19e3   :  { %1571 = shalt.err (!%p1568_p6)
}
0x19e4   :  { %s1572_s14 = scalar_lea.hbm %s1916_s9, 128 }
0x19e5   :  { %p1573_p7 = scmp.ne.s32.totalorder %s1916_s9, %s1572_s14  ;;  %p1576_p8 = scmp.lt.u32.totalorder %s1572_s14, %s1916_s9 }
0x19e7   :  { %p1578_p9 = pnand %p1576_p8, %p1573_p7 }
0x19e9   :  { %1581 = shalt.err (!%p1578_p9)
}
0x19ea   :  { %1169 = dma.vmem_to_hbm [thread:$0]  %s1167_s10, 128, %s1916_s9, [#allocation7]  }
0x19eb   :  { %1584 = dma.done.wait [#allocation4], 128  }
0x19ec   :  { %1585 = vsyncadd [#allocation4], 4294967168 }
0x19ed   :  { %1586 = dma.done.wait [#allocation7], 128  }
0x19ee   :  { %1587 = vsyncadd [#allocation7], 4294967168 }
0x19ef   :  { %1176 = vsyncpa [#allocation3], 1 }
0x19f0   :  { %1177 = vsyncpa [#allocation4], 1 }
0x19f1   :  { %1178 = vsyncpa [#allocation7], 1 }

</bundles_post_ra>
